<compile_context>
chip_gen: v7x
topology: tpu7x:2x2x1
jax: 0.10.0
libtpu: 0.0.40
codegen_flags: <defaults>
</compile_context>

<pallas_src>
import functools
import math

import jax
import jax.numpy as jnp
from jax.experimental import pallas as pl
from jax.experimental.pallas import tpu as pltpu


def _gather_kernel(seg_ref, table_ref, out_ref, *, chunk):
    """seg: (rows, k) int32, table: (S, O) f32, out: (rows, k*O).

    out[r, j*O + c] = table[seg[r, j], c]  (packed-row embedding gather).
    """
    block_rows, k = seg_ref.shape
    S, O = table_ref.shape

    def do_rows(row0, nrows):
        seg = seg_ref[pl.ds(row0, nrows), :]                    # (nrows, k)
        for j in range(k):                                      # k is small, static
            sj = seg[:, j:j + 1]                                # (nrows, 1) narrow
            # ~S wide VPU ops / element: 1 sublane-broadcast + (S-1) selects
            # whose mask is the narrow compare lane-broadcast by the where.
            acc = jnp.broadcast_to(table_ref[0:1, :], (nrows, O))
            for s in range(1, S):
                acc = jnp.where(sj == s, table_ref[s:s + 1, :], acc)
            out_ref[pl.ds(row0, nrows), j * O:(j + 1) * O] = acc.astype(out_ref.dtype)

    n_full = block_rows // chunk
    if n_full > 0:
        def body(c, carry):
            do_rows(pl.multiple_of(c * chunk, chunk), chunk)
            return carry
        jax.lax.fori_loop(0, n_full, body, 0)
    rem = block_rows - n_full * chunk
    if rem:
        do_rows(n_full * chunk, rem)


def multi_segment_embed(segment_ids, emb_table, proj_weight=None, *,
                        out_dtype=jnp.float32):
    """segment_ids: (T, B) int; emb_table: (S, E) f32;
    proj_weight: (O, E) f32 (nn.Linear layout) or None (nn.Identity).
    Returns (T, B, O) in out_dtype (O = E when proj_weight is None)."""
    T, B = segment_ids.shape
    N = T * B
    S, E = emb_table.shape
    table = jnp.asarray(emb_table, jnp.float32)

    if proj_weight is not None:
        O = proj_weight.shape[0]
        # Fold the projection into the table: (table @ W.T)[seg] == table[seg] @ W.T
        fused = jnp.dot(table, jnp.asarray(proj_weight, jnp.float32).T,
                        precision=jax.lax.Precision.HIGHEST)            # (S, O)
    else:
        O = E
        fused = table

    out_dtype = jnp.dtype(out_dtype)
    out_bytes = out_dtype.itemsize

    # Lane packing factor so the output block minor dim is a multiple of 128.
    k = 128 // math.gcd(O, 128)
    while k > 1 and (k * O > 4096 or k > 32):    # pathological O: partially pack
        k //= 2
    W = k * O
    W_pad = pl.cdiv(W, 128) * 128                 # lane-padded width in VMEM

    sub = max(8, 32 // out_bytes)                 # sublane unit for output rows
    unit_ids = sub * k                            # ids per minimal row-unit

    # ---------------- generation-aware, bytes-based tile sizing ----------------
    try:
        vmem_cap = int(pltpu.get_tpu_info().vmem_capacity_bytes)
    except Exception:
        vmem_cap = 64 * 1024 * 1024               # conservative: v7x per-TC VMEM
    if vmem_cap <= 0:
        vmem_cap = 64 * 1024 * 1024
    # Double-buffered working-set target: output block + lane-padded int32 seg
    # block, both x2.  ~28 MiB on v7x (64 MiB VMEM), 48 MiB on v5e/v6e (128 MiB).
    ws_budget = min(int(vmem_cap * 0.45), 48 * 1024 * 1024)
    bytes_per_row = 2 * (W_pad * out_bytes + 128 * 4)
    rows_cap = max(sub, (ws_budget // bytes_per_row) // sub * sub)

    rows_min = (pl.cdiv(N, unit_ids) * unit_ids) // k     # multiple of sub
    m = rows_min // sub
    d_cap = max(1, rows_cap // sub)
    if m >= 2:
        # Guarantee >=2 grid steps so both v7x TensorCores get work.
        d_cap = max(1, min(d_cap, m // 2))
    # Prefer a tile that divides the minimally padded row count (no out[:N] copy).
    best = 1
    for cand in range(min(d_cap, m), 0, -1):
        if m % cand == 0:
            best = cand
            break
    if best * 4 >= min(d_cap, m):
        tile_rows, rows = best * sub, rows_min
    else:
        tile_rows = d_cap * sub
        rows = pl.cdiv(rows_min, tile_rows) * tile_rows
    n_pad = rows * k

    # In-kernel strip-mine chunk: keep per-chunk intermediates within ~32 KiB.
    chunk = (min(128, max(1, (32 * 1024) // max(1, O * out_bytes))) // sub) * sub
    chunk = max(sub, chunk)

    seg = segment_ids.reshape(-1).astype(jnp.int32)
    # nn.Embedding would raise on out-of-range ids; clamp (matches the
    # restrict=False masked_fill path) instead of silently emitting zero rows.
    seg = jnp.clip(seg, 0, S - 1)
    if n_pad != N:
        seg = jnp.pad(seg, (0, n_pad - N))
    seg = seg.reshape(rows, k)

    # Explicit VMEM limit: double-buffered blocks + table + headroom (v5e's
    # default scoped limit is only 16 MiB; v6e/v7x default 32 MiB).
    out_blk = tile_rows * W_pad * out_bytes
    seg_blk = pl.cdiv(tile_rows, 8) * 8 * 128 * 4
    tbl_blk = pl.cdiv(S, 8) * 8 * pl.cdiv(O, 128) * 128 * 4
    vmem_limit = 2 * (out_blk + seg_blk + tbl_blk) + (16 << 20)
    vmem_limit = max(vmem_limit, 32 << 20)
    vmem_limit = min(vmem_limit, vmem_cap - (4 << 20))

    out = pl.pallas_call(
        functools.partial(_gather_kernel, chunk=chunk),
        out_shape=jax.ShapeDtypeStruct((rows, W), out_dtype),
        grid=(rows // tile_rows,),
        in_specs=[
            pl.BlockSpec((tile_rows, k), lambda i: (i, 0)),
            pl.BlockSpec((S, O), lambda i: (0, 0)),
        ],
        # TODO(synk): sweep pipeline_mode=pl.Buffered(3) on out_specs only if a
        # profile shows exposed writeback DMA at tile boundaries.
        out_specs=pl.BlockSpec((tile_rows, W), lambda i: (i, 0)),
        compiler_params=pltpu.CompilerParams(
            dimension_semantics=("parallel",),
            vmem_limit_bytes=int(vmem_limit)),
    )(seg, fused)

    out = out.reshape(n_pad, O)
    if n_pad != N:                 # only when N is not a multiple of sub*k
        out = out[:N]
    return out.reshape(T, B, O)


class MultiSegmentEmbedding:
    """JAX/Pallas re-implementation of the PyTorch MultiSegmentEmbedding forward."""

    def __init__(self, pretrained_weights=None, *, use_segment_emb=True,
                 embedding_dim, output_dim, relative, SEP_token, num_segments,
                 finetune=False, sep_as_new_segment,
                 initialization_method='normal1', key=None):
        assert use_segment_emb, "kernel path requires the segment embedding"
        self.embedding_dim = embedding_dim
        self.output_dim = output_dim
        self.relative = relative
        self.num_segments = 2 if relative else num_segments
        self.SEP_token = SEP_token
        self.sep_as_new_segment = sep_as_new_segment

        key = jax.random.PRNGKey(0) if key is None else key
        k_emb, k_proj = jax.random.split(key)

        shape = (self.num_segments, embedding_dim)
        if pretrained_weights is not None:
            self.emb_table = jnp.asarray(pretrained_weights, jnp.float32)
            assert self.emb_table.shape == shape
        elif initialization_method == 'uniform1':
            self.emb_table = jax.random.uniform(k_emb, shape, jnp.float32, -0.1, 0.1)
        elif initialization_method == 'normal1':
            self.emb_table = 0.02 * jax.random.normal(k_emb, shape, jnp.float32)
        elif initialization_method == 'uniform2':
            b = math.sqrt(3.0)
            self.emb_table = jax.random.uniform(k_emb, shape, jnp.float32, -b, b)
        else:  # 'normal2'
            self.emb_table = jax.random.normal(k_emb, shape, jnp.float32)

        # out_proj: nn.Linear(E, O, bias=False) only when E != O, else Identity.
        if embedding_dim != output_dim:
            bound = math.sqrt(3.0 / embedding_dim)   # xavier_uniform_fan_in_
            self.proj_weight = jax.random.uniform(
                k_proj, (output_dim, embedding_dim), jnp.float32, -bound, bound)
        else:
            self.proj_weight = None

    # TODO(synk): the incremental use_cache/_update_cache decode path (stateful
    # step-by-step cache) is not implemented; full-sequence semantics only.
    def get_segment_ids(self, input_ids, align_pos=0, restrict=True):
        # TODO(synk): align_pos handling of the external get_segment_ids helper
        # is not reproduced (helper not part of the spec); align_pos=0 semantics.
        is_sep = (input_ids == self.SEP_token).astype(jnp.int32)
        inc = is_sep if self.sep_as_new_segment else jnp.concatenate(
            [jnp.zeros_like(is_sep[:1]), is_sep[:-1]], axis=0)
        ids = jnp.cumsum(inc, axis=0)
        if self.relative:
            ids = ids % 2
        if restrict:
            try:
                overflow = bool(jnp.any(ids >= self.num_segments))
            except jax.errors.ConcretizationTypeError:
                overflow = False  # TODO(synk): cannot raise from a traced check
            if overflow:
                raise RuntimeError(
                    'segment id is greater than the maximum embedding index')
        return jnp.clip(ids, 0, self.num_segments - 1)

    def forward(self, input=None, align_pos=0, segment_ids=None, restrict=True):
        assert not (input is None and segment_ids is None)
        if segment_ids is None:
            segment_ids = self.get_segment_ids(input, align_pos, restrict)
        else:
            assert segment_ids.shape == input.shape
        return multi_segment_embed(segment_ids, self.emb_table, self.proj_weight)

    __call__ = forward


if __name__ == "__main__":
    key = jax.random.PRNGKey(0)
    SEP = 1

    # --- 1) projection path (E=32 != O=64), tiny shapes ---
    T, B = 8, 2
    input_ids = jax.random.randint(
        jax.random.fold_in(key, 1), (T, B), 0, 6, dtype=jnp.int32)
    mod = MultiSegmentEmbedding(
        use_segment_emb=True, embedding_dim=32, output_dim=64,
        relative=False, SEP_token=SEP, num_segments=4,
        sep_as_new_segment=False, initialization_method='normal1', key=key)
    out = jax.block_until_ready(mod.forward(input_ids, restrict=False))
    seg = mod.get_segment_ids(input_ids, restrict=False)
    ref = jnp.matmul(jnp.take(mod.emb_table, seg, axis=0), mod.proj_weight.T,
                     precision=jax.lax.Precision.HIGHEST)
    assert out.shape == (T, B, 64), out.shape
    assert jnp.allclose(out, ref, atol=1e-5, rtol=1e-5)

    # --- 2) identity out_proj (E=O=32), relative ids, padded k=4 path ---
    mod2 = MultiSegmentEmbedding(
        use_segment_emb=True, embedding_dim=32, output_dim=32,
        relative=True, SEP_token=SEP, num_segments=4,
        sep_as_new_segment=True, initialization_method='uniform1',
        key=jax.random.fold_in(key, 2))
    out2 = jax.block_until_ready(mod2.forward(input_ids, restrict=False))
    seg2 = mod2.get_segment_ids(input_ids, restrict=False)
    ref2 = jnp.take(mod2.emb_table, seg2, axis=0)
    assert out2.shape == (T, B, 32), out2.shape
    assert jnp.allclose(out2, ref2, atol=1e-6, rtol=1e-6)

    # --- 3) larger sequence: multi-step grid, k=1, in-kernel strip-mining ---
    T3, B3 = 512, 8
    input_ids3 = jax.random.randint(
        jax.random.fold_in(key, 3), (T3, B3), 0, 6, dtype=jnp.int32)
    mod3 = MultiSegmentEmbedding(
        use_segment_emb=True, embedding_dim=48, output_dim=128,
        relative=False, SEP_token=SEP, num_segments=4,
        sep_as_new_segment=False, initialization_method='normal1',
        key=jax.random.fold_in(key, 4))
    out3 = jax.block_until_ready(mod3.forward(input_ids3, restrict=False))
    seg3 = mod3.get_segment_ids(input_ids3, restrict=False)
    ref3 = jnp.matmul(jnp.take(mod3.emb_table, seg3, axis=0), mod3.proj_weight.T,
                      precision=jax.lax.Precision.HIGHEST)
    assert out3.shape == (T3, B3, 128), out3.shape
    assert jnp.allclose(out3, ref3, atol=1e-5, rtol=1e-5)

    print("KERNEL_OK")
</pallas_src>

<mosaic_0001>
module attributes {stable_mosaic.version = 11 : i64} {
  func.func @_gather_kernel(%arg0: i32, %arg1: memref<8x2xi32, #tpu.memory_space<vmem>>, %arg2: memref<4x64xf32, #tpu.memory_space<vmem>>, %arg3: memref<8x128xf32, #tpu.memory_space<vmem>>) attributes {dimension_semantics = [#tpu.dimension_semantics<parallel>], iteration_bounds = array<i64: 1>, scalar_prefetch = 0 : i64, scratch_operands = 0 : i64, tpu.core_type = #tpu.core_type<tc>, window_params = [{transform_indices = @transform_0, window_bounds = array<i64: 8, 2>}, {pipeline_mode = #tpu.pipeline_mode<synchronous>, transform_indices = @transform_1, window_bounds = array<i64: 4, 64>}, {transform_indices = @transform_2, window_bounds = array<i64: 8, 128>}]} {
    %c0 = arith.constant 0 : index
    %c0_0 = arith.constant 0 : index
    %0 = vector.load %arg1[%c0, %c0_0] : memref<8x2xi32, #tpu.memory_space<vmem>>, vector<8x2xi32>
    %1 = vector.extract_strided_slice %0 {offsets = [0, 0], sizes = [8, 1], strides = [1, 1]} : vector<8x2xi32> to vector<8x1xi32>
    %c0_1 = arith.constant 0 : index
    %c0_2 = arith.constant 0 : index
    %2 = vector.load %arg2[%c0_1, %c0_2] : memref<4x64xf32, #tpu.memory_space<vmem>>, vector<1x64xf32>
    %3 = vector.shape_cast %2 : vector<1x64xf32> to vector<1x64xf32>
    %4 = vector.broadcast %3 : vector<1x64xf32> to vector<8x64xf32>
    %c1_i32 = arith.constant 1 : i32
    %5 = vector.broadcast %c1_i32 : i32 to vector<8x1xi32>
    %6 = arith.cmpi eq, %1, %5 : vector<8x1xi32>
    %c1 = arith.constant 1 : index
    %c0_3 = arith.constant 0 : index
    %7 = vector.load %arg2[%c1, %c0_3] : memref<4x64xf32, #tpu.memory_space<vmem>>, vector<1x64xf32>
    %8 = vector.shape_cast %6 : vector<8x1xi1> to vector<8x1xi1>
    %9 = vector.broadcast %8 : vector<8x1xi1> to vector<8x64xi1>
    %10 = vector.shape_cast %7 : vector<1x64xf32> to vector<1x64xf32>
    %11 = vector.broadcast %10 : vector<1x64xf32> to vector<8x64xf32>
    %12 = arith.select %9, %11, %4 : vector<8x64xi1>, vector<8x64xf32>
    %c2_i32 = arith.constant 2 : i32
    %13 = vector.broadcast %c2_i32 : i32 to vector<8x1xi32>
    %14 = arith.cmpi eq, %1, %13 : vector<8x1xi32>
    %c2 = arith.constant 2 : index
    %c0_4 = arith.constant 0 : index
    %15 = vector.load %arg2[%c2, %c0_4] : memref<4x64xf32, #tpu.memory_space<vmem>>, vector<1x64xf32>
    %16 = vector.shape_cast %14 : vector<8x1xi1> to vector<8x1xi1>
    %17 = vector.broadcast %16 : vector<8x1xi1> to vector<8x64xi1>
    %18 = vector.shape_cast %15 : vector<1x64xf32> to vector<1x64xf32>
    %19 = vector.broadcast %18 : vector<1x64xf32> to vector<8x64xf32>
    %20 = arith.select %17, %19, %12 : vector<8x64xi1>, vector<8x64xf32>
    %c3_i32 = arith.constant 3 : i32
    %21 = vector.broadcast %c3_i32 : i32 to vector<8x1xi32>
    %22 = arith.cmpi eq, %1, %21 : vector<8x1xi32>
    %c3 = arith.constant 3 : index
    %c0_5 = arith.constant 0 : index
    %23 = vector.load %arg2[%c3, %c0_5] : memref<4x64xf32, #tpu.memory_space<vmem>>, vector<1x64xf32>
    %24 = vector.shape_cast %22 : vector<8x1xi1> to vector<8x1xi1>
    %25 = vector.broadcast %24 : vector<8x1xi1> to vector<8x64xi1>
    %26 = vector.shape_cast %23 : vector<1x64xf32> to vector<1x64xf32>
    %27 = vector.broadcast %26 : vector<1x64xf32> to vector<8x64xf32>
    %28 = arith.select %25, %27, %20 : vector<8x64xi1>, vector<8x64xf32>
    %c0_6 = arith.constant 0 : index
    %c0_7 = arith.constant 0 : index
    %29 = vector.load %arg3[%c0_6, %c0_7] : memref<8x128xf32, #tpu.memory_space<vmem>>, vector<8x64xf32>
    tpu.vector_store %arg3[%c0_6, %c0_7], %28 {strides = array<i32>} : memref<8x128xf32, #tpu.memory_space<vmem>>, vector<8x64xf32>,
    %30 = vector.extract_strided_slice %0 {offsets = [0, 1], sizes = [8, 1], strides = [1, 1]} : vector<8x2xi32> to vector<8x1xi32>
    %c0_8 = arith.constant 0 : index
    %c0_9 = arith.constant 0 : index
    %31 = vector.load %arg2[%c0_8, %c0_9] : memref<4x64xf32, #tpu.memory_space<vmem>>, vector<1x64xf32>
    %32 = vector.shape_cast %31 : vector<1x64xf32> to vector<1x64xf32>
    %33 = vector.broadcast %32 : vector<1x64xf32> to vector<8x64xf32>
    %c1_i32_10 = arith.constant 1 : i32
    %34 = vector.broadcast %c1_i32_10 : i32 to vector<8x1xi32>
    %35 = arith.cmpi eq, %30, %34 : vector<8x1xi32>
    %c1_11 = arith.constant 1 : index
    %c0_12 = arith.constant 0 : index
    %36 = vector.load %arg2[%c1_11, %c0_12] : memref<4x64xf32, #tpu.memory_space<vmem>>, vector<1x64xf32>
    %37 = vector.shape_cast %35 : vector<8x1xi1> to vector<8x1xi1>
    %38 = vector.broadcast %37 : vector<8x1xi1> to vector<8x64xi1>
    %39 = vector.shape_cast %36 : vector<1x64xf32> to vector<1x64xf32>
    %40 = vector.broadcast %39 : vector<1x64xf32> to vector<8x64xf32>
    %41 = arith.select %38, %40, %33 : vector<8x64xi1>, vector<8x64xf32>
    %c2_i32_13 = arith.constant 2 : i32
    %42 = vector.broadcast %c2_i32_13 : i32 to vector<8x1xi32>
    %43 = arith.cmpi eq, %30, %42 : vector<8x1xi32>
    %c2_14 = arith.constant 2 : index
    %c0_15 = arith.constant 0 : index
    %44 = vector.load %arg2[%c2_14, %c0_15] : memref<4x64xf32, #tpu.memory_space<vmem>>, vector<1x64xf32>
    %45 = vector.shape_cast %43 : vector<8x1xi1> to vector<8x1xi1>
    %46 = vector.broadcast %45 : vector<8x1xi1> to vector<8x64xi1>
    %47 = vector.shape_cast %44 : vector<1x64xf32> to vector<1x64xf32>
    %48 = vector.broadcast %47 : vector<1x64xf32> to vector<8x64xf32>
    %49 = arith.select %46, %48, %41 : vector<8x64xi1>, vector<8x64xf32>
    %c3_i32_16 = arith.constant 3 : i32
    %50 = vector.broadcast %c3_i32_16 : i32 to vector<8x1xi32>
    %51 = arith.cmpi eq, %30, %50 : vector<8x1xi32>
    %c3_17 = arith.constant 3 : index
    %c0_18 = arith.constant 0 : index
    %52 = vector.load %arg2[%c3_17, %c0_18] : memref<4x64xf32, #tpu.memory_space<vmem>>, vector<1x64xf32>
    %53 = vector.shape_cast %51 : vector<8x1xi1> to vector<8x1xi1>
    %54 = vector.broadcast %53 : vector<8x1xi1> to vector<8x64xi1>
    %55 = vector.shape_cast %52 : vector<1x64xf32> to vector<1x64xf32>
    %56 = vector.broadcast %55 : vector<1x64xf32> to vector<8x64xf32>
    %57 = arith.select %54, %56, %49 : vector<8x64xi1>, vector<8x64xf32>
    %c0_19 = arith.constant 0 : index
    %c64 = arith.constant 64 : index
    %58 = vector.load %arg3[%c0_19, %c64] : memref<8x128xf32, #tpu.memory_space<vmem>>, vector<8x64xf32>
    tpu.vector_store %arg3[%c0_19, %c64], %57 {strides = array<i32>} : memref<8x128xf32, #tpu.memory_space<vmem>>, vector<8x64xf32>,
    return
  }
  func.func @transform_0(%arg0: i32) -> (i32, i32) {
    %c0_i32 = arith.constant 0 : i32
    %c0_i32_0 = arith.constant 0 : i32
    return %arg0, %c0_i32 : i32, i32
  }
  func.func @transform_1(%arg0: i32) -> (i32, i32) {
    %c0_i32 = arith.constant 0 : i32
    %c0_i32_0 = arith.constant 0 : i32
    %c0_i32_1 = arith.constant 0 : i32
    return %c0_i32, %c0_i32_0 : i32, i32
  }
  func.func @transform_2(%arg0: i32) -> (i32, i32) {
    %c0_i32 = arith.constant 0 : i32
    %c0_i32_0 = arith.constant 0 : i32
    return %arg0, %c0_i32 : i32, i32
  }
}

</mosaic_0001>

<bundles_post_ra>
// kernel: tpu_custom_call.1
= control target key start
LH: loop header
LB: loop body
LE: loop exit
PB: predicated region body
PF: predicated region fallthrough
CT: control target
= control target key end

     0   :  { %v152_v1 = vmov 1   ;;  %v153_v2 = vmov 0   ;;  %s198_s0 = inlined_call_operand.vmem [shape: s32[8,2], index: 0, kind: input, shape index: {}]   ;;  %s199_s1 = inlined_call_operand.vmem [shape: f32[4,64], index: 1, kind: input, shape index: {}]   ;;  %s200_s2 = inlined_call_operand.hbm [shape: f32[8,128], index: 2, kind: output, shape index: {}]  }
   0x1   :  { %v12_v0 = vld [vmem:[%s198_s0] sm:$0xff]  ;;  %123 = vset.pattern.permute.xlu0 %v152_v1  ;;  %124 = vset.pattern.permute.xlu1 %v152_v1 }
   0x2   :  { %vm18_vm0 = vcmp.eq.s32.totalorder %v12_v0, 1  ;;  %vm30_vm1 = vcmp.eq.s32.totalorder %v12_v0, 2  ;;  %vm42_vm2 = vcmp.eq.s32.totalorder %v12_v0, 3 }
   0x3   :  { %v20_v3 = vsel %vm18_vm0, 1, %v153_v2  ;;  %v44_v4 = vsel %vm42_vm2, 1, %v153_v2 }
   0x4   :  { %7 = vsyncpa [#allocation3], 0  ;;  %63 = vperm.xlu0 %123, %v20_v3   ;;  %83 = vperm.xlu1 %124, %v44_v4   ;;  %v32_v5 = vsel %vm30_vm1, 1, %v153_v2  ;;  %v115_v8 = vld [vmem:[%s199_s1] ss:$0 sm:$0xff]  ;;  %s154_s18 = smov 64  }
   0x5   :  { %v116_v9 = vld [vmem:[%s199_s1 + $0x1] ss:$0 sm:$0xff]  ;;  %v117_v10 = vld [vmem:[%s199_s1 + $0x2] ss:$0 sm:$0xff]  ;;  %v118_v12 = vld [vmem:[%s199_s1 + $0x3] ss:$0 sm:$0xff] }
   0x6   :  { %vm54_vm8 = vcmask 523264   ;;  %s155_s19 = smov [#allocation2]   ;;  %vm95_vm10 = vcmask 1048064  }
   0x7   :  { %s103_s20 = sshll.u32 %s155_s19, 4  ;;  %s104_s20 = int_to_ptr.vmem [resolvable:$true] %s103_s20 }
   0x8   :  { %73 = vperm.xlu0 %123, %v32_v5   ;;  %125 = vset.pattern.permute.xlu1 %v153_v2  ;;  %s128_s1 = scalar_lea.vmem %s104_s20, 128  ;;  %p133_p1 = scmp.lt.s32.totalorder %s104_s20, %s104_s20 }
   0x9   :  { %22 = vperm.xlu1 %125, %v20_v3   ;;  %p129_p0 = scmp.ne.s32.totalorder %s104_s20, %s128_s1  ;;  %p134_p2 = scmp.lt.s32.totalorder %s128_s1, %s128_s1 }
   0xb   :  { %p135_p3 = por %p134_p2, %p133_p1 }
   0xc   :  { %126 = vset.pattern.permute.xlu0 %v153_v2 }
   0xd   :  { %34 = vperm.xlu0 %126, %v32_v5   ;;  %46 = vperm.xlu1 %125, %v44_v4   ;;  %p136_p4 = pnand %p135_p3, %p129_p0 }
  0x11   :  { %127 = vset.pattern.permute.xlu0 %v152_v1 }
  0x83   :  { %v64_v6 = vpop.permute.xlu0 %63  ;;  %v84_v7 = vpop.permute.xlu1 %83 }
  0x84   :  { %vm65_vm3 = vcmp.eq.s32.totalorder %v64_v6, 1  ;;  %vm85_vm4 = vcmp.eq.s32.totalorder %v84_v7, 1 }
  0x85   :  { %v70_v13 = vsel %vm65_vm3, %v116_v9, %v115_v8 }
  0x87   :  { %v74_v11 = vpop.permute.xlu0 %73 }
  0x88   :  { %vm75_vm5 = vcmp.eq.s32.totalorder %v74_v11, 1  ;;  %v23_v14 = vpop.permute.xlu1 %22 }
  0x89   :  { %v80_v15 = vsel %vm75_vm5, %v117_v10, %v70_v13  ;;  %vm24_vm6 = vcmp.eq.s32.totalorder %v23_v14, 1 }
  0x8a   :  { %v90_v16 = vsel %vm85_vm4, %v118_v12, %v80_v15  ;;  %v29_v17 = vsel %vm24_vm6, %v116_v9, %v115_v8 }
  0x8b   :  { %92 = vrot.lane.b32.xlu1 %v90_v16, %s154_s18 }
  0x8c   :  { %v35_v18 = vpop.permute.xlu0 %34  ;;  %v47_v19 = vpop.permute.xlu1 %46 }
  0x8d   :  { %vm36_vm7 = vcmp.eq.s32.totalorder %v35_v18, 1  ;;  %vm48_vm9 = vcmp.eq.s32.totalorder %v47_v19, 1 }
  0x8e   :  { %v41_v20 = vsel %vm36_vm7, %v117_v10, %v29_v17 }
  0x8f   :  { %v53_v21 = vsel %vm48_vm9, %v118_v12, %v41_v20 }
  0x90   :  { %55 = vst.msk [vmem:[#allocation2] sm:$0xff] %vm54_vm8, %v53_v21 }
  0xfd   :  { %v93_v22 = vpop.permute.xlu1 %92 }
  0xfe   :  { %96 = vst.msk [vmem:[#allocation2] sm:$0xff] %vm95_vm10, %v93_v22 }
  0xff   :  { %139 = shalt.err (!%p136_p4)
}
 0x100   :  { %s140_s23 = scalar_lea.hbm %s200_s2, 128 }
 0x101   :  { %p141_p5 = scmp.ne.s32.totalorder %s200_s2, %s140_s23  ;;  %p144_p6 = scmp.lt.u32.totalorder %s140_s23, %s200_s2 }
 0x103   :  { %p146_p7 = pnand %p144_p6, %p141_p5 }
 0x105   :  { %149 = shalt.err (!%p146_p7)
}
 0x106   :  { %106 = dma.vmem_to_hbm [thread:$0]  %s104_s20, 128, %s200_s2, [#allocation3]  }
 0x107   :  { %150 = dma.done.wait [#allocation3], 128  }
 0x108   :  { %151 = vsyncadd [#allocation3], 4294967168 }
 0x109   :  { %110 = vsyncpa [#allocation3], 1 }

</bundles_post_ra>
